<compile_context>
chip_gen: v6e
topology: v6e:2x2x1
jax: 0.10.0
libtpu: 0.0.40
codegen_flags: <defaults>
</compile_context>

<pallas_src>
import functools
import inspect

import jax
import jax.numpy as jnp
from jax.experimental import pallas as pl
from jax.experimental.pallas import tpu as pltpu


def _round_up(n: int, m: int) -> int:
    return ((n + m - 1) // m) * m


def _cdiv(a: int, b: int) -> int:
    return -(-a // b)


# --------------------------------------------------------------------------
# Hardware / feature queries (capability probes only; never mask kernel errors)
# --------------------------------------------------------------------------
def _physical_vmem_bytes() -> int:
    try:
        info = pltpu.get_tpu_info()
        v = getattr(info, "vmem_capacity_bytes", None)
        if v:
            return int(v)
    except Exception:
        pass
    return 64 * 1024 * 1024  # conservative: v7x per-TensorCore VMEM


def _tpu_defaults():
    """(default row tile, TensorCores per chip) for the current TPU generation."""
    kind = ""
    try:
        kind = jax.devices()[0].device_kind.lower()
    except Exception:
        pass
    if "v5" in kind:
        return 128, 1   # v5e: 4x128^2 MXU, per-step overhead already negligible
    if "v6" in kind:
        return 512, 1   # v6e: 128 MiB VMEM -> amortize per-step overhead
    if "v7" in kind:
        return 256, 2   # v7x: 64 MiB VMEM/TC, 2 TensorCores
    return 256, 1


def _supports_buffered() -> bool:
    """Explicit feature check for single-buffered (resident) weight blocks."""
    if not hasattr(pl, "Buffered"):
        return False
    try:
        return "pipeline_mode" in inspect.signature(pl.BlockSpec).parameters
    except (TypeError, ValueError):
        return False


# --------------------------------------------------------------------------
# VMEM working-set model -> hidden-dim chunk selection
# --------------------------------------------------------------------------
def _working_set_bytes(E, tk, tm, x_isz, w_isz, nbuf_w) -> int:
    weights = nbuf_w * (2 * E * tk * w_isz + tk * 4 + E * 4)  # W1/W2 chunk, b1 chunk, b2
    io = 4 * tm * E * x_isz                                    # x + out, double-buffered
    hidden = 2 * tm * tk * 4                                   # f32 hidden + cast copy
    acc = tm * E * 4                                           # f32 accumulator scratch
    return int(weights + io + hidden + acc)


def _pick_hidden_tile(E, H, tm, x_isz, w_isz, budget, single_buffer_ok) -> int:
    nbuf_full = 1 if single_buffer_ok else 2
    if _working_set_bytes(E, H, tm, x_isz, w_isz, nbuf_full) <= budget:
        return H                                   # weights fully resident
    # Chunk H: candidates must divide H and be lane-aligned (multiple of 128).
    cands = [tk for tk in range(128, H, 128) if H % tk == 0]
    for tk in sorted(cands, reverse=True):
        if _working_set_bytes(E, tk, tm, x_isz, w_isz, 2) <= budget:
            return tk
    return min(cands) if cands else H


# --------------------------------------------------------------------------
# Kernel
# --------------------------------------------------------------------------
def _mlp_kernel(x_ref, w1_ref, b1_ref, w2_ref, b2_ref, o_ref, acc_ref):
    # x_ref:  (tm, E) tile of token rows
    # w1_ref: (E, tk_h), b1_ref: (1, tk_h)  -- hidden-dim chunk kh
    # w2_ref: (tk_h, E), b2_ref: (1, E)
    # acc_ref: (tm, E) f32 accumulator over hidden-dim chunks
    kh = pl.program_id(1)

    @pl.when(kh == 0)
    def _init():
        acc_ref[...] = jnp.zeros_like(acc_ref)

    cdt = w1_ref.dtype  # compute dtype of the MXU operands (bf16 by default)

    # First linear over this H-chunk: bf16 operands, f32 accumulation on MXU.
    h = jnp.dot(x_ref[...].astype(cdt), w1_ref[...],
                preferred_element_type=jnp.float32)
    h = h + b1_ref[...]  # bias pre-cast to f32 in the wrapper

    # Exact (erf-based) GELU in f32, matching nn.GELU(approximate='none').
    h = 0.5 * h * (1.0 + jax.lax.erf(h * jnp.float32(0.7071067811865476)))

    # Dropout (p) is identity at inference time.

    # Second linear chunk: accumulate the partial (tm, E) product in f32.
    acc_ref[...] += jnp.dot(h.astype(cdt), w2_ref[...],
                            preferred_element_type=jnp.float32)

    @pl.when(kh == pl.num_programs(1) - 1)
    def _finalize():
        o_ref[...] = (acc_ref[...] + b2_ref[...]).astype(o_ref.dtype)


@functools.partial(
    jax.jit,
    static_argnames=("tm", "tk_h", "single_buffer_weights", "vmem_limit"))
def _mlp_call(x2d, w1, b1_2d, w2, b2_2d, *, tm, tk_h, single_buffer_weights,
              vmem_limit):
    M_rows, E = x2d.shape
    H = w1.shape[1]
    n_rows = _cdiv(M_rows, tm)
    n_kh = H // tk_h

    # Grid-invariant weight/bias blocks (only when H is not chunked): keep a
    # single resident copy instead of double-buffering.
    wkwargs = {}
    if single_buffer_weights and n_kh == 1:
        wkwargs = dict(pipeline_mode=pl.Buffered(1))

    in_specs = [
        pl.BlockSpec((tm, E), lambda i, k: (i, 0)),                # x rows (streamed)
        pl.BlockSpec((E, tk_h), lambda i, k: (0, k), **wkwargs),   # W1 chunk
        pl.BlockSpec((1, tk_h), lambda i, k: (0, k), **wkwargs),   # b1 chunk
        pl.BlockSpec((tk_h, E), lambda i, k: (k, 0), **wkwargs),   # W2 chunk
        pl.BlockSpec((1, E), lambda i, k: (0, 0), **wkwargs),      # b2
    ]
    out_spec = pl.BlockSpec((tm, E), lambda i, k: (i, 0))

    x_isz = jnp.dtype(x2d.dtype).itemsize
    w_isz = jnp.dtype(w1.dtype).itemsize
    cost = pl.CostEstimate(
        flops=int(4 * M_rows * E * H),
        transcendentals=int(M_rows * H),
        bytes_accessed=int(2 * M_rows * E * x_isz + 2 * E * H * w_isz
                           + (H + E) * 4),
    )

    return pl.pallas_call(
        _mlp_kernel,
        out_shape=jax.ShapeDtypeStruct((M_rows, E), x2d.dtype),
        grid_spec=pltpu.PrefetchScalarGridSpec(
            num_scalar_prefetch=0,
            grid=(n_rows, n_kh),
            in_specs=in_specs,
            out_specs=out_spec,
            scratch_shapes=[pltpu.VMEM((tm, E), jnp.float32)],
        ),
        compiler_params=pltpu.CompilerParams(
            dimension_semantics=("parallel", "arbitrary"),
            vmem_limit_bytes=int(vmem_limit),
        ),
        cost_estimate=cost,
    )(x2d, w1, b1_2d, w2, b2_2d)


# --------------------------------------------------------------------------
# Public wrapper
# --------------------------------------------------------------------------
def mlp_forward(x, w1, b1, w2, b2, *, tm=None, compute_dtype=jnp.bfloat16):
    """x: (B, S, E) -> (B, S, E).  Fused Linear-GELU-Linear (eval-mode MLP).

    tm:            row (token) tile; None -> generation-aware default.
    compute_dtype: dtype of the MXU operands (bf16 default, f32 for exactness).
                   Accumulation / bias / GELU math is always f32.
    """
    B, S, E = x.shape
    H = w1.shape[1]
    M = B * S

    tm_default, n_cores = _tpu_defaults()
    if tm is None:
        tm = tm_default
    # Make sure the "parallel" row axis has >= n_cores steps (v7x: 2 TCs) so
    # both TensorCores get work even for small token counts.
    if n_cores > 1 and M >= 8 * n_cores:
        tm = min(tm, _round_up(_cdiv(M, n_cores), 8))
    tm_eff = max(8, min(tm, _round_up(M, 8)))

    x2d = x.reshape(M, E)
    if M % 8 != 0:
        # Ragged (non 8-aligned) token counts need a small pad; 8-aligned M
        # relies on Pallas partial edge row-blocks instead of a full HBM copy.
        x2d = jnp.pad(x2d, ((0, _round_up(M, 8) - M), (0, 0)))

    cdt = jnp.dtype(compute_dtype)
    w1c = w1.astype(cdt)
    w2c = w2.astype(cdt)
    b1f = b1.astype(jnp.float32).reshape(1, H)
    b2f = b2.astype(jnp.float32).reshape(1, E)

    phys = _physical_vmem_bytes()
    budget = (phys * 3) // 4            # leave headroom for compiler scratch
    sb = _supports_buffered()
    tk_h = _pick_hidden_tile(E, H, tm_eff, jnp.dtype(x2d.dtype).itemsize,
                             cdt.itemsize, budget, sb)
    ws = _working_set_bytes(E, tk_h, tm_eff, jnp.dtype(x2d.dtype).itemsize,
                            cdt.itemsize, nbuf_w=2)   # generous (double-buffer) estimate
    vmem_limit = int(min(budget, max(32 * 1024 * 1024, (3 * ws) // 2)))

    try:
        out2d = _mlp_call(x2d, w1c, b1f, w2c, b2f, tm=tm_eff, tk_h=tk_h,
                          single_buffer_weights=sb, vmem_limit=vmem_limit)
    except Exception as e:
        # Narrow fallback: only retry (with default double-buffered weights)
        # when the failure is specifically about the pl.Buffered(1) hint;
        # genuine errors (shape mismatch, VMEM OOM, ...) are re-raised.
        msg = str(e)
        if sb and any(t in msg for t in ("pipeline_mode", "Buffered", "buffer_count")):
            out2d = _mlp_call(x2d, w1c, b1f, w2c, b2f, tm=tm_eff, tk_h=tk_h,
                              single_buffer_weights=False, vmem_limit=vmem_limit)
        else:
            raise

    return out2d[:M].reshape(B, S, E)


def init_params(key, embed_dim, mlp_hidden_size):
    """Deterministic nn.Linear-style init (uniform(-1/sqrt(fan_in), +))."""
    k1, k2, k3, k4 = jax.random.split(key, 4)
    bound1 = 1.0 / (embed_dim ** 0.5)
    bound2 = 1.0 / (mlp_hidden_size ** 0.5)
    w1 = jax.random.uniform(k1, (embed_dim, mlp_hidden_size),
                            jnp.float32, -bound1, bound1)
    b1 = jax.random.uniform(k2, (mlp_hidden_size,), jnp.float32, -bound1, bound1)
    w2 = jax.random.uniform(k3, (mlp_hidden_size, embed_dim),
                            jnp.float32, -bound2, bound2)
    b2 = jax.random.uniform(k4, (embed_dim,), jnp.float32, -bound2, bound2)
    return w1, b1, w2, b2


if __name__ == "__main__":
    # Small shapes consistent with the module: batch=2, seq=8, embed=32, hidden=64.
    B, S, E, H = 2, 8, 32, 64
    key = jax.random.PRNGKey(0)
    kx, kp = jax.random.split(key)

    x = jax.random.normal(kx, (B, S, E), dtype=jnp.float32)
    w1, b1, w2, b2 = init_params(kp, E, H)
    x2 = x.reshape(-1, E)
    sqrt_half = jnp.float32(0.7071067811865476)

    # --- default (bf16-operand) path vs matched bf16-math reference --------
    out_bf16 = jax.block_until_ready(mlp_forward(x, w1, b1, w2, b2))
    hb = jnp.dot(x2.astype(jnp.bfloat16), w1.astype(jnp.bfloat16),
                 preferred_element_type=jnp.float32) + b1
    hb = 0.5 * hb * (1.0 + jax.lax.erf(hb * sqrt_half))
    ref_b = (jnp.dot(hb.astype(jnp.bfloat16), w2.astype(jnp.bfloat16),
                     preferred_element_type=jnp.float32) + b2).reshape(B, S, E)
    assert jnp.allclose(out_bf16, ref_b.astype(out_bf16.dtype),
                        atol=1e-2, rtol=1e-2), "mismatch vs bf16 reference"

    # --- exact f32 path vs erf-GELU reference -------------------------------
    out_f32 = jax.block_until_ready(
        mlp_forward(x, w1, b1, w2, b2, compute_dtype=jnp.float32))
    hf = x2 @ w1 + b1
    hf = 0.5 * hf * (1.0 + jax.lax.erf(hf * sqrt_half))
    ref_f = (hf @ w2 + b2).reshape(B, S, E)
    assert jnp.allclose(out_f32, ref_f, atol=1e-4, rtol=1e-4), \
        "mismatch vs f32 reference"

    print("KERNEL_OK")
</pallas_src>

<mosaic_0001>
module attributes {stable_mosaic.version = 11 : i64} {
  func.func @_mlp_kernel(%arg0: i32, %arg1: i32, %arg2: memref<16x32xf32, #tpu.memory_space<vmem>>, %arg3: memref<32x64xbf16, #tpu.memory_space<vmem>>, %arg4: memref<1x64xf32, #tpu.memory_space<vmem>>, %arg5: memref<64x32xbf16, #tpu.memory_space<vmem>>, %arg6: memref<1x32xf32, #tpu.memory_space<vmem>>, %arg7: memref<16x32xf32, #tpu.memory_space<vmem>>, %arg8: memref<16x32xf32, #tpu.memory_space<vmem>>) attributes {dimension_semantics = [#tpu.dimension_semantics<parallel>, #tpu.dimension_semantics<arbitrary>], iteration_bounds = array<i64: 1, 1>, scalar_prefetch = 0 : i64, scratch_operands = 1 : i64, tpu.core_type = #tpu.core_type<tc>, window_params = [{transform_indices = @transform_0, window_bounds = array<i64: 16, 32>}, {pipeline_mode = #tpu.pipeline_mode<synchronous>, transform_indices = @transform_1, window_bounds = array<i64: 32, 64>}, {pipeline_mode = #tpu.pipeline_mode<synchronous>, transform_indices = @transform_2, window_bounds = array<i64: 1, 64>}, {pipeline_mode = #tpu.pipeline_mode<synchronous>, transform_indices = @transform_3, window_bounds = array<i64: 64, 32>}, {pipeline_mode = #tpu.pipeline_mode<synchronous>, transform_indices = @transform_4, window_bounds = array<i64: 1, 32>}, {transform_indices = @transform_5, window_bounds = array<i64: 16, 32>}]} {
    %c0_i32 = arith.constant 0 : i32
    %0 = arith.cmpi eq, %arg1, %c0_i32 : i32
    %1 = arith.extui %0 : i1 to i32
    %c0_i32_0 = arith.constant 0 : i32
    %2 = arith.cmpi ne, %1, %c0_i32_0 : i32
    scf.if %2 {
      %cst_18 = arith.constant 0.000000e+00 : f32
      %27 = vector.broadcast %cst_18 : f32 to vector<16x32xf32>
      %c0_19 = arith.constant 0 : index
      %c0_20 = arith.constant 0 : index
      %28 = vector.load %arg8[%c0_19, %c0_20] : memref<16x32xf32, #tpu.memory_space<vmem>>, vector<16x32xf32>
      tpu.vector_store %arg8[%c0_19, %c0_20], %27 {strides = array<i32>} : memref<16x32xf32, #tpu.memory_space<vmem>>, vector<16x32xf32>,
    } else {
    }
    %c0 = arith.constant 0 : index
    %c0_1 = arith.constant 0 : index
    %3 = vector.load %arg2[%c0, %c0_1] : memref<16x32xf32, #tpu.memory_space<vmem>>, vector<16x32xf32>
    %4 = arith.truncf %3 : vector<16x32xf32> to vector<16x32xbf16>
    %c0_2 = arith.constant 0 : index
    %c0_3 = arith.constant 0 : index
    %5 = vector.load %arg3[%c0_2, %c0_3] : memref<32x64xbf16, #tpu.memory_space<vmem>>, vector<32x64xbf16>
    %cst = arith.constant dense<0.000000e+00> : vector<16x64xf32>
    %6 = tpu.matmul %4, %5, %cst {dimension_numbers = #tpu.dot_dimension_numbers<[1], [0], [0], [1], [0, 0, 1, 1], [], []>} : vector<16x32xbf16>, vector<32x64xbf16>, vector<16x64xf32> -> vector<16x64xf32>
    %c0_4 = arith.constant 0 : index
    %c0_5 = arith.constant 0 : index
    %7 = vector.load %arg4[%c0_4, %c0_5] : memref<1x64xf32, #tpu.memory_space<vmem>>, vector<1x64xf32>
    %8 = vector.broadcast %7 : vector<1x64xf32> to vector<16x64xf32>
    %9 = arith.addf %6, %8 : vector<16x64xf32>
    %cst_6 = arith.constant 5.000000e-01 : f32
    %10 = vector.broadcast %cst_6 : f32 to vector<16x64xf32>
    %11 = arith.mulf %10, %9 : vector<16x64xf32>
    %cst_7 = arith.constant 0.707106769 : f32
    %12 = vector.broadcast %cst_7 : f32 to vector<16x64xf32>
    %13 = arith.mulf %9, %12 : vector<16x64xf32>
    %14 = math.erf %13 : vector<16x64xf32>
    %cst_8 = arith.constant 1.000000e+00 : f32
    %15 = vector.broadcast %cst_8 : f32 to vector<16x64xf32>
    %16 = arith.addf %15, %14 : vector<16x64xf32>
    %17 = arith.mulf %11, %16 : vector<16x64xf32>
    %c0_9 = arith.constant 0 : index
    %c0_10 = arith.constant 0 : index
    %18 = vector.load %arg8[%c0_9, %c0_10] : memref<16x32xf32, #tpu.memory_space<vmem>>, vector<16x32xf32>
    %19 = arith.truncf %17 : vector<16x64xf32> to vector<16x64xbf16>
    %c0_11 = arith.constant 0 : index
    %c0_12 = arith.constant 0 : index
    %20 = vector.load %arg5[%c0_11, %c0_12] : memref<64x32xbf16, #tpu.memory_space<vmem>>, vector<64x32xbf16>
    %cst_13 = arith.constant dense<0.000000e+00> : vector<16x32xf32>
    %21 = tpu.matmul %19, %20, %cst_13 {dimension_numbers = #tpu.dot_dimension_numbers<[1], [0], [0], [1], [0, 0, 1, 1], [], []>} : vector<16x64xbf16>, vector<64x32xbf16>, vector<16x32xf32> -> vector<16x32xf32>
    %22 = arith.addf %18, %21 : vector<16x32xf32>
    %c0_14 = arith.constant 0 : index
    %c0_15 = arith.constant 0 : index
    %23 = vector.load %arg8[%c0_14, %c0_15] : memref<16x32xf32, #tpu.memory_space<vmem>>, vector<16x32xf32>
    tpu.vector_store %arg8[%c0_14, %c0_15], %22 {strides = array<i32>} : memref<16x32xf32, #tpu.memory_space<vmem>>, vector<16x32xf32>,
    %c0_i32_16 = arith.constant 0 : i32
    %24 = arith.cmpi eq, %arg1, %c0_i32_16 : i32
    %25 = arith.extui %24 : i1 to i32
    %c0_i32_17 = arith.constant 0 : i32
    %26 = arith.cmpi ne, %25, %c0_i32_17 : i32
    scf.if %26 {
      %c0_18 = arith.constant 0 : index
      %c0_19 = arith.constant 0 : index
      %27 = vector.load %arg8[%c0_18, %c0_19] : memref<16x32xf32, #tpu.memory_space<vmem>>, vector<16x32xf32>
      %c0_20 = arith.constant 0 : index
      %c0_21 = arith.constant 0 : index
      %28 = vector.load %arg6[%c0_20, %c0_21] : memref<1x32xf32, #tpu.memory_space<vmem>>, vector<1x32xf32>
      %29 = vector.broadcast %28 : vector<1x32xf32> to vector<16x32xf32>
      %30 = arith.addf %27, %29 : vector<16x32xf32>
      %c0_22 = arith.constant 0 : index
      %c0_23 = arith.constant 0 : index
      %31 = vector.load %arg7[%c0_22, %c0_23] : memref<16x32xf32, #tpu.memory_space<vmem>>, vector<16x32xf32>
      tpu.vector_store %arg7[%c0_22, %c0_23], %30 {strides = array<i32>} : memref<16x32xf32, #tpu.memory_space<vmem>>, vector<16x32xf32>,
    } else {
    }
    return
  }
  func.func @transform_0(%arg0: i32, %arg1: i32) -> (i32, i32) {
    %c0_i32 = arith.constant 0 : i32
    %c0_i32_0 = arith.constant 0 : i32
    return %arg0, %c0_i32 : i32, i32
  }
  func.func @transform_1(%arg0: i32, %arg1: i32) -> (i32, i32) {
    %c0_i32 = arith.constant 0 : i32
    %c0_i32_0 = arith.constant 0 : i32
    return %c0_i32, %arg1 : i32, i32
  }
  func.func @transform_2(%arg0: i32, %arg1: i32) -> (i32, i32) {
    %c0_i32 = arith.constant 0 : i32
    %c0_i32_0 = arith.constant 0 : i32
    return %c0_i32, %arg1 : i32, i32
  }
  func.func @transform_3(%arg0: i32, %arg1: i32) -> (i32, i32) {
    %c0_i32 = arith.constant 0 : i32
    %c0_i32_0 = arith.constant 0 : i32
    return %arg1, %c0_i32 : i32, i32
  }
  func.func @transform_4(%arg0: i32, %arg1: i32) -> (i32, i32) {
    %c0_i32 = arith.constant 0 : i32
    %c0_i32_0 = arith.constant 0 : i32
    %c0_i32_1 = arith.constant 0 : i32
    return %c0_i32, %c0_i32_0 : i32, i32
  }
  func.func @transform_5(%arg0: i32, %arg1: i32) -> (i32, i32) {
    %c0_i32 = arith.constant 0 : i32
    %c0_i32_0 = arith.constant 0 : i32
    return %arg0, %c0_i32 : i32, i32
  }
}

</mosaic_0001>

<bundles_post_ra>
// kernel: _mlp_call.1
= control target key start
LH: loop header
LB: loop body
LE: loop exit
PB: predicated region body
PF: predicated region fallthrough
CT: control target
= control target key end

     0   :  { %v301_v1 = vmov 0.0   ;;  %vm302_vm0 = vmmov 0   ;;  %vm26_vm1 = vcmask 261120   ;;  %s376_s0 = inlined_call_operand.vmem [shape: f32[16,32], index: 0, kind: input, shape index: {}]   ;;  %s377_s1 = inlined_call_operand.vmem [shape: bf16[32,64], index: 1, kind: input, shape index: {}]   ;;  %s378_s2 = inlined_call_operand.vmem [shape: f32[1,64], index: 2, kind: input, shape index: {}]   ;;  %s379_s3 = inlined_call_operand.vmem [shape: bf16[64,32], index: 3, kind: input, shape index: {}]   ;;  %s380_s4 = inlined_call_operand.vmem [shape: f32[1,32], index: 4, kind: input, shape index: {}]   ;;  %s381_s5 = inlined_call_operand.hbm [shape: f32[16,32], index: 5, kind: output, shape index: {}]  }
   0x1   :  { %v269_v0 = vld [vmem:[%s377_s1 + $0x8] sm:$0xff]   ;;  %244 = vmatprep.subr.bf16.mxu0 %v301_v1  ;;  %252 = vmatprep.subr.bf16.mxu1 %v301_v1  ;;  %v270_v2 = vld [vmem:[%s377_s1] sm:$0xff]   ;;  %27 = vst.msk [vmem:[#allocation2] sm:$0xff] %vm26_vm1, %v301_v1  ;;  %28 = vst.msk [vmem:[#allocation2 + $0x8] sm:$0xff] %vm26_vm1, %v301_v1 }
   0x2   :  { %245 = vmatpush3.bf16.msra.mxu0 %v269_v0  ;;  %248 = vmatprep.mubr.msk.bf16.mxu0 %vm302_vm0, %v301_v1  ;;  %v29_v3 = vld [vmem:[%s376_s0] sm:$0xff]  ;;  %v30_v4 = vld [vmem:[%s376_s0 + $0x8] sm:$0xff] }
   0x3   :  { %246 = vmatprep.subr.bf16.mxu0 %v301_v1  ;;  %260 = vmatprep.mubr.msk.bf16.mxu1 %vm302_vm0, %v301_v1  ;;  %v31_v5 = vpack.c.bf16 %v30_v4, %v29_v3 }
   0x4   :  { %10 = vsyncpa [#allocation4], 0  ;;  %v271_v6 = vld [vmem:[%s379_s3 + $0x18] sm:$0xff]   ;;  %v272_v7 = vld [vmem:[%s379_s3 + $0x10] sm:$0xff]   ;;  %vm145_vm2 = vcmask 523264   ;;  %s303_s9 = smov [#allocation3]  }
   0x5   :  { %253 = vmatpush3.bf16.msra.mxu1 %v271_v6  ;;  %v273_v8 = vld [vmem:[%s379_s3 + $0x8] sm:$0xff]   ;;  %v274_v9 = vld [vmem:[%s379_s3] sm:$0xff]   ;;  %s215_s10 = sshll.u32 %s303_s9, 4  ;;  %s216_s10 = int_to_ptr.vmem [resolvable:$true] %s215_s10 }
   0x6   :  { %247 = vmatpush3.bf16.msra.mxu0 %v270_v2  ;;  %254 = vmatprep.subr.bf16.mxu1 %v301_v1  ;;  %v226_v10 = vld [vmem:[%s378_s2] ss:$0 sm:$0xff]  ;;  %s279_s11 = scalar_lea.vmem %s216_s10, 256  ;;  %p284_p1 = scmp.lt.s32.totalorder %s216_s10, %s216_s10 }
   0x7   :  { %v235_v36 = vld [vmem:[%s380_s4] ss:$0 sm:$0xff]  ;;  %p280_p0 = scmp.ne.s32.totalorder %s216_s10, %s279_s11  ;;  %p285_p2 = scmp.lt.s32.totalorder %s279_s11, %s279_s11 }
   0x8   :  { %v110_v28 = vld [vmem:[#allocation2] sm:$0xff]  ;;  %v111_v32 = vld [vmem:[#allocation2 + $0x8] sm:$0xff] }
   0x9   :  { %249 = vmatmul.mubr.msk.bf16.vlgmr.msra.gmra.mxu0 %vm26_vm1, %v31_v5  ;;  %255 = vmatpush3.bf16.msra.mxu1 %v272_v7  ;;  %p286_p3 = por %p285_p2, %p284_p1 }
   0xa   :  { %256 = vmatprep.subr.bf16.mxu1 %v301_v1 }
   0xb   :  { %p287_p4 = pnand %p286_p3, %p280_p0 }
   0xd   :  { %257 = vmatpush3.bf16.msra.mxu1 %v273_v8 }
   0xe   :  { %258 = vmatprep.subr.bf16.mxu1 %v301_v1 }
  0x11   :  { %259 = vmatpush3.bf16.msra.mxu1 %v274_v9 }
  0xc9   :  { %v93_v11 = vpop.f32.mrf.mxu0 }
  0xca   :  { %v94_v12 = vadd.f32 %v226_v10, %v93_v11 }
  0xcb   :  { %v250_v13 = vpop.f32.mrf.mxu0 }
  0xcc   :  { %v102_v14 = vmul.f32 0.70710677, %v94_v12  ;;  %v100_v22 = vmul.f32 0.5, %v94_v12 }
  0xcd   :  { %v96_v15 = vpop.f32.mrf.mxu0 }
  0xce   :  { %275 = verf.f32 %v102_v14  ;;  %v97_v16 = vadd.f32 %v226_v10, %v96_v15 }
  0xcf   :  { %v251_v17 = vpop.f32.mrf.mxu0 }
  0xd0   :  { %v103_v18 = vmul.f32 0.70710677, %v97_v16  ;;  %v101_v23 = vmul.f32 0.5, %v97_v16 }
  0xd2   :  { %277 = verf.f32 %v103_v18 }
  0xdb   :  { %v276_v19 = vpop.eup %275 }
  0xdc   :  { %v106_v20 = vadd.f32 1.0, %v276_v19 }
  0xde   :  { %v108_v25 = vmul.f32 %v106_v20, %v100_v22 }
  0xdf   :  { %v278_v21 = vpop.eup %277 }
  0xe0   :  { %v107_v24 = vadd.f32 1.0, %v278_v21 }
  0xe2   :  { %v109_v26 = vmul.f32 %v107_v24, %v101_v23 }
  0xe4   :  { %v112_v27 = vpack.c.bf16 %v109_v26, %v108_v25 }
  0xe6   :  { %261 = vmatmul.mubr.msk.bf16.vlgmr.msra.gmra.mxu1 %vm145_vm2, %v112_v27 }
 0x1a6   :  { %v183_v29 = vpop.f32.mrf.mxu1 }
 0x1a7   :  { %v190_v30 = vadd.f32 %v183_v29, %v110_v28 }
 0x1a8   :  { %v262_v31 = vpop.f32.mrf.mxu1 }
 0x1a9   :  { %192 = vst.msk [vmem:[#allocation2] sm:$0xff] %vm26_vm1, %v190_v30 }
 0x1aa   :  { %v186_v33 = vpop.f32.mrf.mxu1 }
 0x1ab   :  { %v191_v34 = vadd.f32 %v186_v33, %v111_v32 }
 0x1ac   :  { %v263_v35 = vpop.f32.mrf.mxu1 }
 0x1ad   :  { %193 = vst.msk [vmem:[#allocation2 + $0x8] sm:$0xff] %vm26_vm1, %v191_v34 }
 0x1b0   :  { %v197_v37 = vld [vmem:[#allocation2] sm:$0xff] }
 0x1b1   :  { %v206_v38 = vadd.f32 %v235_v36, %v197_v37 }
 0x1b3   :  { %208 = vst.msk [vmem:[#allocation3] sm:$0xff] %vm26_vm1, %v206_v38 }
 0x1b4   :  { %v198_v39 = vld [vmem:[#allocation2 + $0x8] sm:$0xff] }
 0x1b5   :  { %v207_v40 = vadd.f32 %v235_v36, %v198_v39 }
 0x1b7   :  { %209 = vst.msk [vmem:[#allocation3 + $0x8] sm:$0xff] %vm26_vm1, %v207_v40 }
 0x1b8   :  { %290 = shalt.err (!%p287_p4)
}
 0x1b9   :  { %s304_s12 = smov 128   ;;  %s305_s4 = smov 8  }
 0x1ba   :  { %221 = dma.vmem_to_hbm [thread:$0]  %s216_s10, 256, %s381_s5, [#allocation4], %s304_s12, %s304_s12, %s305_s4  }
 0x1bb   :  { %299 = dma.done.wait [#allocation4], 256  }
 0x1bc   :  { %300 = vsyncadd [#allocation4], 4294967040 }
 0x1bd   :  { %225 = vsyncpa [#allocation4], 1 }

</bundles_post_ra>
